<compile_context>
chip_gen: v5e
topology: v5e:2x2
jax: 0.10.0
libtpu: 0.0.40
codegen_flags: <defaults>
</compile_context>

<pallas_src>
import functools

import jax
import jax.numpy as jnp
from jax.experimental import pallas as pl
from jax.experimental.pallas import tpu as pltpu

LANES = 128
SUBLANES = 8
MAX_TILE_ROWS = 8192        # (8192, 128) f32 tile = 4 MiB per input per buffer
CHUNK_TARGET_ROWS = 512     # in-kernel compute chunk (keeps temporaries small)


def _ceil_div(a, b):
    return -(-a // b)


def _num_shards():
    """2 shards (leading 'parallel' grid axis) only on 2-TensorCore chips
    (v7x / v4 / v5p); 1 on single-TC v5e / v6e where it only adds waste."""
    try:
        kind = jax.devices()[0].device_kind.lower()
    except Exception:  # defensive: never let detection break the kernel
        return 1
    if "v7" in kind or "tpu7" in kind or "v4" in kind or "v5p" in kind:
        return 2
    return 1


def _pow(x, exponent):
    """x ** exponent, specialized to repeated multiplies for small integer exponents."""
    e = float(exponent)
    if e.is_integer() and 0.0 <= e <= 16.0:
        k = int(e)
        if k == 0:
            return jnp.ones_like(x)
        result = None
        base = x
        while k:
            if k & 1:
                result = base if result is None else result * base
            k >>= 1
            if k:
                base = base * base
        return result
    return x ** exponent    # fallback: transcendental pow on the EUP


def _focal_loss_elementwise(pred, target, alpha, gamma):
    """Pure-JAX elementwise focal loss (mirrors the PyTorch focal_loss)."""
    eps = 1e-12
    pred = pred.astype(jnp.float32)
    target = target.astype(jnp.float32)
    pos_loss = -jnp.log(pred + eps) * _pow(1.0 - pred, alpha) * target
    neg_loss = -jnp.log(1.0 - pred + eps) * _pow(pred, alpha) * _pow(1.0 - target, gamma)
    return pos_loss + neg_loss


def _focal_sum_kernel(pred_ref, tgt_ref, out_ref, *, alpha, gamma, m_valid,
                      tile_rows, chunk_rows, blocks_per_shard, needs_mask):
    """Focal loss on one (tile_rows, 128) tile, accumulated into a resident
    (1, 8, 128) per-shard partial-sum block. Compute is chunked so that large
    DMA tiles do not blow up live-value VMEM/vreg pressure."""
    s = pl.program_id(0)          # shard (parallel) axis
    i = pl.program_id(1)          # reduction axis (output block resident)

    @pl.when(i == 0)
    def _():
        out_ref[...] = jnp.zeros_like(out_ref)

    base_row = (s * blocks_per_shard + i) * tile_rows
    num_chunks = tile_rows // chunk_rows
    align = chunk_rows & -chunk_rows   # largest power-of-two divisor

    def fold(x):
        # (chunk_rows, 128) -> (1, 8, 128): pure VPU adds, no cross-lane work.
        return x.reshape(-1, SUBLANES, LANES).sum(axis=0)[None]

    def compute_block():
        def chunk_body(c, carry):
            row0 = pl.multiple_of(c * chunk_rows, align)
            p = pred_ref[pl.ds(row0, chunk_rows), :].astype(jnp.float32)
            t = tgt_ref[pl.ds(row0, chunk_rows), :].astype(jnp.float32)
            one_m_p = 1.0 - p
            eps = 1e-12
            pos_loss = -jnp.log(p + eps) * _pow(one_m_p, alpha) * t
            neg_loss = (-jnp.log(one_m_p + eps) * _pow(p, alpha)
                        * _pow(1.0 - t, gamma))
            loss = pos_loss + neg_loss

            if needs_mask:
                chunk_start = base_row + row0
                is_interior = chunk_start + chunk_rows <= m_valid

                @pl.when(is_interior)
                def _():
                    # Interior chunk: no mask ops at all.
                    out_ref[...] += fold(loss)

                @pl.when(jnp.logical_and(jnp.logical_not(is_interior),
                                         chunk_start < m_valid))
                def _():
                    # Edge chunk straddling the valid extent: mask padded rows.
                    row_idx = jax.lax.broadcasted_iota(jnp.int32, loss.shape, 0)
                    masked = jnp.where(chunk_start + row_idx < m_valid,
                                       loss, 0.0)
                    out_ref[...] += fold(masked)
            else:
                out_ref[...] += fold(loss)
            return carry

        jax.lax.fori_loop(0, num_chunks, chunk_body, 0, unroll=True)

    if needs_mask:
        # Skip the whole body for fully out-of-range (clamped duplicate) blocks.
        @pl.when(base_row < m_valid)
        def _():
            compute_block()
    else:
        compute_block()


def _focal_loss_sum_pallas(pred, target, alpha, gamma):
    """Scalar SUM of focal loss over all elements (float32)."""
    n = pred.size
    pred_flat = pred.reshape(-1)
    tgt_flat = target.reshape(-1)

    n_main = (n // LANES) * LANES
    m = n_main // LANES
    total = jnp.float32(0.0)

    if m > 0:
        pred2d = pred_flat[:n_main].reshape(m, LANES)
        tgt2d = tgt_flat[:n_main].reshape(m, LANES)

        # Tile/grid sizing: split rows across shards (only on 2-TC chips),
        # then pick blocks per shard and a tile height that is a multiple of
        # the chunk size (and of 16, so bf16 inputs stay legal).
        num_shards = _num_shards()
        rows_per_shard = _ceil_div(m, num_shards)
        blocks_per_shard = _ceil_div(rows_per_shard, MAX_TILE_ROWS)
        raw_tile = _ceil_div(rows_per_shard, blocks_per_shard)
        if raw_tile >= CHUNK_TARGET_ROWS:
            chunk_rows = CHUNK_TARGET_ROWS
        else:
            chunk_rows = _ceil_div(raw_tile, 16) * 16
        tile_rows = _ceil_div(raw_tile, chunk_rows) * chunk_rows
        covered = num_shards * blocks_per_shard * tile_rows
        last_block = max(_ceil_div(m, tile_rows) - 1, 0)

        def idx_map(s, i):
            # Clamp so DMAs always target an in-bounds row block; the kernel's
            # edge masking / block skip discards out-of-range contributions.
            return (jnp.minimum(s * blocks_per_shard + i, last_block), 0)

        kernel = functools.partial(
            _focal_sum_kernel, alpha=alpha, gamma=gamma, m_valid=m,
            tile_rows=tile_rows, chunk_rows=chunk_rows,
            blocks_per_shard=blocks_per_shard, needs_mask=(covered != m))

        # Raise scoped VMEM enough for double-buffered inputs (v5e default is
        # only ~16 MiB) but cap well below v7x's 64 MiB physical VMEM.
        in_itemsize = pred2d.dtype.itemsize + tgt2d.dtype.itemsize
        dbuf_in_bytes = 2 * tile_rows * LANES * in_itemsize
        vmem_limit = int(min(48 << 20, dbuf_in_bytes + (16 << 20)))

        n_elems = m * LANES
        cost = pl.CostEstimate(
            flops=12 * n_elems,
            transcendentals=2 * n_elems,
            bytes_accessed=n_elems * in_itemsize
            + num_shards * SUBLANES * LANES * 4)

        partials = pl.pallas_call(
            kernel,
            out_shape=jax.ShapeDtypeStruct((num_shards, SUBLANES, LANES),
                                           jnp.float32),
            grid_spec=pltpu.PrefetchScalarGridSpec(
                num_scalar_prefetch=0,
                grid=(num_shards, blocks_per_shard),
                in_specs=[
                    pl.BlockSpec((tile_rows, LANES), idx_map),
                    pl.BlockSpec((tile_rows, LANES), idx_map),
                ],
                out_specs=pl.BlockSpec((1, SUBLANES, LANES),
                                       lambda s, i: (s, 0, 0)),
            ),
            # TODO(synk): if an xprof trace on v7x shows only one TensorCore
            # busy, switch axis 0 to pltpu.CORE_PARALLEL.
            compiler_params=pltpu.CompilerParams(
                dimension_semantics=("parallel", "arbitrary"),
                vmem_limit_bytes=vmem_limit),
            cost_estimate=cost,
        )(pred2d, tgt2d)
        total = total + jnp.sum(partials)

    if n_main < n:
        # TODO(synk): <128-element ragged tail summed in plain JAX (negligible).
        p_tail = pred_flat[n_main:]
        t_tail = tgt_flat[n_main:]
        total = total + jnp.sum(_focal_loss_elementwise(p_tail, t_tail,
                                                        alpha, gamma))
    return total


class FocalLossPallas:
    """JAX/Pallas equivalent of the PyTorch FocalLoss module (forward only)."""

    def __init__(self, alpha=2.0, gamma=4.0, reduction="mean", loss_weight=1.0):
        self.alpha = alpha
        self.gamma = gamma
        self.reduction = reduction
        self.loss_weight = loss_weight

    def _single(self, pred, target, weight, avg_factor, reduction):
        a, g, lw = self.alpha, self.gamma, self.loss_weight
        # Fast Pallas path: any full-sum-style reduction without elementwise weight.
        needs_full_sum = weight is None and (
            (avg_factor is None and reduction in ("mean", "sum"))
            or (avg_factor is not None and reduction == "mean"))
        if needs_full_sum:
            s = _focal_loss_sum_pallas(pred, target, a, g)
            if avg_factor is not None:
                return lw * s / avg_factor
            if reduction == "mean":
                return lw * s / pred.size
            return lw * s

        # TODO(synk): elementwise `weight` / reduction="none" paths kept in plain JAX.
        loss = lw * _focal_loss_elementwise(pred, target, a, g)
        if weight is not None:
            loss = loss * weight
        if avg_factor is None:
            if reduction == "mean":
                return jnp.mean(loss)
            if reduction == "sum":
                return jnp.sum(loss)
            return loss
        if reduction == "mean":
            return jnp.sum(loss) / avg_factor
        if reduction == "none":
            return loss
        raise ValueError('avg_factor can not be used with reduction="sum"')

    def __call__(self, preds, target, weight=None, avg_factor=None,
                 reduction_override=None):
        assert reduction_override in (None, "none", "mean", "sum")
        reduction = reduction_override if reduction_override else self.reduction
        is_seq = isinstance(preds, (list, tuple))
        pred_list = list(preds) if is_seq else [preds]

        loss_total = 0.0
        for pred in pred_list:
            loss_total = loss_total + self._single(pred, target, weight,
                                                   avg_factor, reduction)
        if is_seq:
            return loss_total / len(preds)
        return loss_total


if __name__ == "__main__":
    key = jax.random.PRNGKey(0)
    k1, k2, k3, k4 = jax.random.split(key, 4)

    module = FocalLossPallas(alpha=2.0, gamma=4.0, reduction="mean",
                             loss_weight=1.0)

    # NCHW inputs: sigmoid-like predictions in (0, 1), gaussian-heatmap-like
    # targets in [0, 1].
    shape = (2, 4, 16, 16)
    pred = jax.nn.sigmoid(jax.random.normal(k1, shape, dtype=jnp.float32))
    target = jax.random.uniform(k2, shape, dtype=jnp.float32)

    out = jax.block_until_ready(module(pred, target))
    ref = jnp.mean(_focal_loss_elementwise(pred, target, 2.0, 4.0))
    assert jnp.allclose(out, ref, rtol=1e-5, atol=1e-6), (out, ref)

    # Non-128-divisible element count: exercises the clamped/masked edge block
    # and the plain-JAX tail, plus the "sum" reduction override.
    shape2 = (2, 3, 13, 7)
    pred2 = jax.nn.sigmoid(jax.random.normal(k3, shape2, dtype=jnp.float32))
    target2 = jax.random.uniform(k4, shape2, dtype=jnp.float32)
    out2 = jax.block_until_ready(module(pred2, target2,
                                        reduction_override="sum"))
    ref2 = jnp.sum(_focal_loss_elementwise(pred2, target2, 2.0, 4.0))
    assert jnp.allclose(out2, ref2, rtol=1e-4, atol=1e-4), (out2, ref2)

    print("KERNEL_OK")
</pallas_src>

<mosaic_0001>
module attributes {stable_mosaic.version = 11 : i64} {
  func.func @_focal_sum_kernel(%arg0: i32, %arg1: i32, %arg2: memref<16x128xf32, #tpu.memory_space<vmem>>, %arg3: memref<16x128xf32, #tpu.memory_space<vmem>>, %arg4: memref<1x8x128xf32, #tpu.memory_space<vmem>>) attributes {dimension_semantics = [#tpu.dimension_semantics<parallel>, #tpu.dimension_semantics<arbitrary>], iteration_bounds = array<i64: 1, 1>, scalar_prefetch = 0 : i64, scratch_operands = 0 : i64, tpu.core_type = #tpu.core_type<tc>, window_params = [{transform_indices = @transform_0, window_bounds = array<i64: 16, 128>}, {transform_indices = @transform_1, window_bounds = array<i64: 16, 128>}, {transform_indices = @transform_2, window_bounds = array<i64: 1, 8, 128>}]} {
    %c0_i32 = arith.constant 0 : i32
    %0 = arith.cmpi eq, %arg1, %c0_i32 : i32
    %1 = arith.extui %0 : i1 to i32
    %c0_i32_0 = arith.constant 0 : i32
    %2 = arith.cmpi ne, %1, %c0_i32_0 : i32
    scf.if %2 {
      %cst_15 = arith.constant 0.000000e+00 : f32
      %38 = vector.broadcast %cst_15 : f32 to vector<1x8x128xf32>
      %c0_16 = arith.constant 0 : index
      %c0_17 = arith.constant 0 : index
      %c0_18 = arith.constant 0 : index
      %39 = vector.load %arg4[%c0_16, %c0_17, %c0_18] : memref<1x8x128xf32, #tpu.memory_space<vmem>>, vector<1x8x128xf32>
      tpu.vector_store %arg4[%c0_16, %c0_17, %c0_18], %38 {strides = array<i32>} : memref<1x8x128xf32, #tpu.memory_space<vmem>>, vector<1x8x128xf32>,
    } else {
    }
    %c0_i32_1 = arith.constant 0 : i32
    %c16_i32 = arith.constant 16 : i32
    %3 = arith.muli %c0_i32_1, %c16_i32 : i32
    %4 = tpu.assume_multiple %3, 16 : i32
    %5 = arith.index_cast %4 : i32 to index
    %c0 = arith.constant 0 : index
    %6 = vector.load %arg2[%5, %c0] : memref<16x128xf32, #tpu.memory_space<vmem>>, vector<16x128xf32>
    %7 = arith.index_cast %4 : i32 to index
    %c0_2 = arith.constant 0 : index
    %8 = vector.load %arg3[%7, %c0_2] : memref<16x128xf32, #tpu.memory_space<vmem>>, vector<16x128xf32>
    %cst = arith.constant 1.000000e+00 : f32
    %9 = vector.broadcast %cst : f32 to vector<16x128xf32>
    %10 = arith.subf %9, %6 : vector<16x128xf32>
    %cst_3 = arith.constant 9.99999996E-13 : f32
    %11 = vector.broadcast %cst_3 : f32 to vector<16x128xf32>
    %12 = arith.addf %6, %11 : vector<16x128xf32>
    %13 = math.log %12 : vector<16x128xf32>
    %cst_4 = arith.constant 0.000000e+00 : f32
    %14 = vector.broadcast %cst_4 : f32 to vector<16x128xf32>
    %15 = arith.subf %14, %13 : vector<16x128xf32>
    %16 = arith.mulf %10, %10 : vector<16x128xf32>
    %17 = arith.mulf %15, %16 : vector<16x128xf32>
    %18 = arith.mulf %17, %8 : vector<16x128xf32>
    %cst_5 = arith.constant 9.99999996E-13 : f32
    %19 = vector.broadcast %cst_5 : f32 to vector<16x128xf32>
    %20 = arith.addf %10, %19 : vector<16x128xf32>
    %21 = math.log %20 : vector<16x128xf32>
    %cst_6 = arith.constant 0.000000e+00 : f32
    %22 = vector.broadcast %cst_6 : f32 to vector<16x128xf32>
    %23 = arith.subf %22, %21 : vector<16x128xf32>
    %24 = arith.mulf %6, %6 : vector<16x128xf32>
    %25 = arith.mulf %23, %24 : vector<16x128xf32>
    %cst_7 = arith.constant 1.000000e+00 : f32
    %26 = vector.broadcast %cst_7 : f32 to vector<16x128xf32>
    %27 = arith.subf %26, %8 : vector<16x128xf32>
    %28 = arith.mulf %27, %27 : vector<16x128xf32>
    %29 = arith.mulf %28, %28 : vector<16x128xf32>
    %30 = arith.mulf %25, %29 : vector<16x128xf32>
    %31 = arith.addf %18, %30 : vector<16x128xf32>
    %c0_8 = arith.constant 0 : index
    %c0_9 = arith.constant 0 : index
    %c0_10 = arith.constant 0 : index
    %32 = vector.load %arg4[%c0_8, %c0_9, %c0_10] : memref<1x8x128xf32, #tpu.memory_space<vmem>>, vector<1x8x128xf32>
    %33 = vector.shape_cast %31 : vector<16x128xf32> to vector<2x8x128xf32>
    %cst_11 = arith.constant dense<0.000000e+00> : vector<8x128xf32>
    %34 = vector.multi_reduction <add>, %33, %cst_11 [0] : vector<2x8x128xf32> to vector<8x128xf32>
    %35 = vector.shape_cast %34 : vector<8x128xf32> to vector<1x8x128xf32>
    %36 = arith.addf %32, %35 : vector<1x8x128xf32>
    %c0_12 = arith.constant 0 : index
    %c0_13 = arith.constant 0 : index
    %c0_14 = arith.constant 0 : index
    %37 = vector.load %arg4[%c0_12, %c0_13, %c0_14] : memref<1x8x128xf32, #tpu.memory_space<vmem>>, vector<1x8x128xf32>
    tpu.vector_store %arg4[%c0_12, %c0_13, %c0_14], %36 {strides = array<i32>} : memref<1x8x128xf32, #tpu.memory_space<vmem>>, vector<1x8x128xf32>,
    %c1_i32 = arith.constant 1 : i32
    return
  }
  func.func @transform_0(%arg0: i32, %arg1: i32) -> (i32, i32) {
    %c1_i32 = arith.constant 1 : i32
    %0 = arith.muli %arg0, %c1_i32 : i32
    %1 = arith.addi %0, %arg1 : i32
    %c0_i32 = arith.constant 0 : i32
    %2 = arith.minsi %1, %c0_i32 : i32
    %c0_i32_0 = arith.constant 0 : i32
    %c0_i32_1 = arith.constant 0 : i32
    return %2, %c0_i32_0 : i32, i32
  }
  func.func @transform_1(%arg0: i32, %arg1: i32) -> (i32, i32) {
    %c1_i32 = arith.constant 1 : i32
    %0 = arith.muli %arg0, %c1_i32 : i32
    %1 = arith.addi %0, %arg1 : i32
    %c0_i32 = arith.constant 0 : i32
    %2 = arith.minsi %1, %c0_i32 : i32
    %c0_i32_0 = arith.constant 0 : i32
    %c0_i32_1 = arith.constant 0 : i32
    return %2, %c0_i32_0 : i32, i32
  }
  func.func @transform_2(%arg0: i32, %arg1: i32) -> (i32, i32, i32) {
    %c0_i32 = arith.constant 0 : i32
    %c0_i32_0 = arith.constant 0 : i32
    %c0_i32_1 = arith.constant 0 : i32
    return %arg0, %c0_i32, %c0_i32_0 : i32, i32, i32
  }
}

</mosaic_0001>

<bundles_post_ra>
// kernel: tpu_custom_call.1
= control target key start
LH: loop header
LB: loop body
LE: loop exit
PB: predicated region body
PF: predicated region fallthrough
CT: control target
= control target key end

     0   :  { %7 = vsyncpa [#allocation3], 0  ;;  %s258_s0 = inlined_call_operand.hbm [shape: f32[16,128], index: 0, kind: input, shape index: {}]   ;;  %s259_s1 = inlined_call_operand.hbm [shape: f32[16,128], index: 1, kind: input, shape index: {}]   ;;  %s260_s2 = inlined_call_operand.hbm [shape: f32[1,8,128], index: 2, kind: output, shape index: {}]  }
   0x1   :  { %8 = vsyncpa [#allocation6], 0 }
   0x2   :  { %9 = vsyncpa [#allocation4], 0  ;;  %s20_s11 = sshll.u32 %s258_s0, 4  ;;  %s229_s12 = smov [#allocation2]   ;;  %s21_s11 = int_to_ptr.hbm [resolvable:$true] %s20_s11 }
   0x3   :  { %s22_s13 = sshll.u32 %s229_s12, 4  ;;  %s39_s16 = sshll.u32 %s259_s1, 4  ;;  %s23_s13 = int_to_ptr.vmem [resolvable:$true] %s22_s13  ;;  %s40_s16 = int_to_ptr.hbm [resolvable:$true] %s39_s16 }
   0x4   :  { %s230_s17 = smov 128   ;;  %s231_s18 = smov 8  }
   0x5   :  { %28 = dma.hbm_to_vmem [thread:$0]  %s21_s11, 256, %s23_s13, [#allocation3], %s230_s17, %s230_s17, %s231_s18  }
   0x6   :  { %s232_s19 = smov [#allocation5]  }
   0x7   :  { %s41_s20 = sshll.u32 %s232_s19, 4  ;;  %s42_s20 = int_to_ptr.vmem [resolvable:$true] %s41_s20 }
   0x8   :  { %47 = dma.hbm_to_vmem [thread:$0]  %s40_s16, 256, %s42_s20, [#allocation6], %s230_s17, %s230_s17, %s231_s18  }
   0x9   :  { %223 = dma.done.wait [#allocation3], 256  }
   0xa   :  { %224 = vsyncadd [#allocation3], 4294967040 }
   0xb   :  { %225 = dma.done.wait [#allocation6], 256  }
   0xc   :  { %226 = vsyncadd [#allocation6], 4294967040  ;;  %v69_v0 = vld [vmem:[#allocation2] sm:$0xff]  ;;  %v70_v1 = vld [vmem:[#allocation2 + $0x8] sm:$0xff]  ;;  %s233_s0 = smov [#allocation7]   ;;  %s122_s23 = sshll.u32 %s260_s2, 4  ;;  %s123_s23 = int_to_ptr.hbm [resolvable:$true] %s122_s23 }
   0xd   :  { %v73_v2 = vsub.f32 1.0, %v69_v0  ;;  %v74_v3 = vsub.f32 1.0, %v70_v1  ;;  %v75_v4 = vadd.f32 1e-12, %v69_v0  ;;  %v76_v5 = vadd.f32 1e-12, %v70_v1 }
   0xe   :  { %v71_v6 = vld [vmem:[#allocation5] sm:$0xff]  ;;  %v72_v8 = vld [vmem:[#allocation5 + $0x8] sm:$0xff]  ;;  %v97_v24 = vmul.f32 %v69_v0, %v69_v0  ;;  %v98_v27 = vmul.f32 %v70_v1, %v70_v1  ;;  %s120_s1 = sshll.u32 %s233_s0, 4  ;;  %s121_s1 = int_to_ptr.vmem [resolvable:$true] %s120_s1 }
   0xf   :  { %143 = vlog2.f32 %v75_v4  ;;  %v89_v7 = vadd.f32 1e-12, %v73_v2  ;;  %v90_v9 = vadd.f32 1e-12, %v74_v3  ;;  %v101_v10 = vsub.f32 1.0, %v71_v6 }
  0x10   :  { %145 = vlog2.f32 %v76_v5  ;;  %v102_v11 = vsub.f32 1.0, %v72_v8  ;;  %v83_v15 = vmul.f32 %v73_v2, %v73_v2  ;;  %v84_v19 = vmul.f32 %v74_v3, %v74_v3 }
  0x11   :  { %147 = vlog2.f32 %v89_v7  ;;  %v103_v16 = vmul.f32 %v101_v10, %v101_v10 }
  0x12   :  { %149 = vlog2.f32 %v90_v9  ;;  %v104_v20 = vmul.f32 %v102_v11, %v102_v11 }
  0x13   :  { %v105_v30 = vmul.f32 %v103_v16, %v103_v16 }
  0x14   :  { %v106_v33 = vmul.f32 %v104_v20, %v104_v20 }
  0x15   :  { %v144_v12 = vpop.eup %143 }
  0x16   :  { %v146_v13 = vpop.eup %145  ;;  %v78_v14 = vmul.f32 0.6931472, %v144_v12 }
  0x17   :  { %v148_v17 = vpop.eup %147  ;;  %v80_v18 = vmul.f32 0.6931472, %v146_v13 }
  0x18   :  { %v150_v21 = vpop.eup %149  ;;  %v81_v22 = vsub.f32 0.0, %v78_v14  ;;  %v92_v23 = vmul.f32 0.6931472, %v148_v17 }
  0x19   :  { %v82_v25 = vsub.f32 0.0, %v80_v18  ;;  %v94_v26 = vmul.f32 0.6931472, %v150_v21 }
  0x1a   :  { %v85_v28 = vmul.f32 %v83_v15, %v81_v22  ;;  %v95_v29 = vsub.f32 0.0, %v92_v23 }
  0x1b   :  { %v86_v31 = vmul.f32 %v84_v19, %v82_v25  ;;  %v96_v32 = vsub.f32 0.0, %v94_v26 }
  0x1c   :  { %v87_v34 = vmul.f32 %v85_v28, %v71_v6  ;;  %v99_v35 = vmul.f32 %v97_v24, %v95_v29 }
  0x1d   :  { %v88_v36 = vmul.f32 %v86_v31, %v72_v8  ;;  %v100_v37 = vmul.f32 %v98_v27, %v96_v32 }
  0x1e   :  { %v107_v38 = vmul.f32 %v105_v30, %v99_v35 }
  0x1f   :  { %v108_v39 = vmul.f32 %v106_v33, %v100_v37 }
  0x20   :  { %v109_v40 = vadd.f32 %v107_v38, %v87_v34 }
  0x21   :  { %v110_v41 = vadd.f32 %v108_v39, %v88_v36 }
  0x23   :  { %v112_v42 = vadd.f32 %v110_v41, %v109_v40 }
  0x25   :  { %114 = vst [vmem:[#allocation7] sm:$0xff] %v112_v42 }
  0x26   :  { %125 = dma.vmem_to_hbm [thread:$0]  %s121_s1, 128, %s123_s23, [#allocation4]  }
  0x27   :  { %227 = dma.done.wait [#allocation4], 128  }
  0x28   :  { %228 = vsyncadd [#allocation4], 4294967168 }
  0x29   :  { %130 = vsyncpa [#allocation3], 1 }
  0x2a   :  { %131 = vsyncpa [#allocation6], 1 }
  0x2b   :  { %132 = vsyncpa [#allocation4], 1 }

</bundles_post_ra>
